<compile_context>
chip_gen: v7x
topology: tpu7x:2x2x1
jax: 0.10.0
libtpu: 0.0.40
codegen_flags: <defaults>
</compile_context>

<pallas_src>
import jax
import jax.numpy as jnp
from jax.experimental import pallas as pl
from jax.experimental.pallas import tpu as pltpu

EPS = 1e-5  # torch.nn.LayerNorm default eps


def _sigmoid(x):
    return 1.0 / (1.0 + jnp.exp(-x))


def docstring_embedder_kernel(ids_ref,        # SMEM (B_pad, T) int32 (scalar prefetch)
                              table_ref,      # VMEM (V, E)         embedding table
                              wih_ref,        # VMEM (E, 4E)        = weight_ih_l0.T
                              whh_ref,        # VMEM (E, 4E)        = weight_hh_l0.T
                              bias_ref,       # VMEM (1, 4E)        = b_ih + b_hh
                              gamma_ref,      # VMEM (1, E)
                              beta_ref,       # VMEM (1, E)
                              out_ref,        # VMEM (B_BLK, E)
                              x_ref, h_ref, c_ref, acc_ref):  # VMEM scratch (B_BLK, E) f32
    b_blk, e = out_ref.shape
    t_len = ids_ref.shape[1]
    row0 = pl.program_id(0) * b_blk

    h_ref[...] = jnp.zeros_like(h_ref)
    c_ref[...] = jnp.zeros_like(c_ref)
    acc_ref[...] = jnp.zeros_like(acc_ref)

    def time_step(t, carry):
        # In-kernel embedding gather from the VMEM-resident table:
        #   x_t[b, :] = table[ids[row0 + b, t], :]
        for b in range(b_blk):  # b_blk is small and static
            idx = ids_ref[row0 + b, t]
            x_ref[pl.ds(b, 1), :] = table_ref[pl.ds(idx, 1), :]
        x_t = x_ref[...]

        gates = (jnp.dot(x_t, wih_ref[...], preferred_element_type=jnp.float32)
                 + jnp.dot(h_ref[...], whh_ref[...], preferred_element_type=jnp.float32)
                 + bias_ref[...])
        # PyTorch LSTM gate order: input, forget, cell, output
        i_g = _sigmoid(gates[:, 0 * e:1 * e])
        f_g = _sigmoid(gates[:, 1 * e:2 * e])
        g_g = jnp.tanh(gates[:, 2 * e:3 * e])
        o_g = _sigmoid(gates[:, 3 * e:4 * e])

        c_new = f_g * c_ref[...] + i_g * g_g
        h_new = o_g * jnp.tanh(c_new)
        c_ref[...] = c_new
        h_ref[...] = h_new
        acc_ref[...] = acc_ref[...] + h_new
        return carry

    jax.lax.fori_loop(0, t_len, time_step, 0)

    # mean over the sequence dim, then LayerNorm over E (sum / sum-of-squares form)
    m = acc_ref[...] * (1.0 / t_len)
    inv_e = 1.0 / e
    mu = jnp.sum(m, axis=-1, keepdims=True) * inv_e
    ms = jnp.sum(m * m, axis=-1, keepdims=True) * inv_e
    var = ms - mu * mu
    y = (m - mu) * jax.lax.rsqrt(var + EPS)
    out_ref[...] = (y * gamma_ref[...] + beta_ref[...]).astype(out_ref.dtype)


def docstring_embedder_forward(ids, emb_table, w_ih_t, w_hh_t, bias, gamma, beta,
                               *, block_b=8):
    """ids: (B, T) int; emb_table: (V, E); w_*_t: (E, 4E); bias: (4E,); gamma/beta: (E,)."""
    ids = ids.astype(jnp.int32)            # PyTorch LongTensor -> int32
    B, T = ids.shape
    V, E = emb_table.shape
    assert E % 128 == 0, "pad emb_size to a multiple of 128 (TPU lane dim)"
    assert block_b % 8 == 0, "batch block must be a multiple of 8 (f32 sublanes)"

    B_pad = ((B + block_b - 1) // block_b) * block_b
    if B_pad != B:
        ids = jnp.pad(ids, ((0, B_pad - B), (0, 0)))   # pad rows use id 0 (padding row)

    bias2 = bias.reshape(1, 4 * E)
    gamma2 = gamma.reshape(1, E)
    beta2 = beta.reshape(1, E)

    vmem_spec = pl.BlockSpec(memory_space=pltpu.MemorySpace.VMEM)

    # VMEM budget: resident table/weights/params + output double buffer + scratch.
    resident = (emb_table.nbytes + w_ih_t.nbytes + w_hh_t.nbytes
                + bias2.nbytes + gamma2.nbytes + beta2.nbytes)
    block_bytes = (2 + 4) * block_b * E * 4
    vmem_limit = int(min(64 * 2 ** 20, max(2 * (resident + block_bytes), 4 * 2 ** 20)))

    grid_spec = pltpu.PrefetchScalarGridSpec(
        num_scalar_prefetch=1,                      # ids -> SMEM, visible in-kernel
        grid=(B_pad // block_b,),
        in_specs=[vmem_spec] * 6,                   # table, w_ih, w_hh, bias, gamma, beta
        out_specs=pl.BlockSpec((block_b, E), lambda i, ids_ref: (i, 0)),
        scratch_shapes=[pltpu.VMEM((block_b, E), jnp.float32)] * 4,  # x, h, c, acc
    )

    out = pl.pallas_call(
        docstring_embedder_kernel,
        out_shape=jax.ShapeDtypeStruct((B_pad, E), emb_table.dtype),
        grid_spec=grid_spec,
        compiler_params=pltpu.CompilerParams(
            dimension_semantics=("parallel",),      # batch blocks are independent
            vmem_limit_bytes=vmem_limit,
        ),
    )(ids, emb_table, w_ih_t, w_hh_t, bias2, gamma2, beta2)
    return out[:B]


def reference_forward(ids, emb_table, w_ih_t, w_hh_t, bias, gamma, beta):
    """Pure-JAX reference: embed -> LSTM -> mean over seq -> LayerNorm."""
    x = emb_table[ids]                              # (B, T, E)
    B, T, E = x.shape
    h = jnp.zeros((B, E), jnp.float32)
    c = jnp.zeros((B, E), jnp.float32)
    acc = jnp.zeros((B, E), jnp.float32)
    for t in range(T):
        gates = x[:, t, :] @ w_ih_t + h @ w_hh_t + bias
        i_g = _sigmoid(gates[:, :E])
        f_g = _sigmoid(gates[:, E:2 * E])
        g_g = jnp.tanh(gates[:, 2 * E:3 * E])
        o_g = _sigmoid(gates[:, 3 * E:])
        c = f_g * c + i_g * g_g
        h = o_g * jnp.tanh(c)
        acc = acc + h
    m = acc / T
    mu = m.mean(-1, keepdims=True)
    var = ((m - mu) ** 2).mean(-1, keepdims=True)
    return (m - mu) / jnp.sqrt(var + EPS) * gamma + beta


if __name__ == "__main__":
    key = jax.random.PRNGKey(0)
    k_tab, k_wih, k_whh, k_b, k_ids = jax.random.split(key, 5)

    # Small deterministic shapes: num_buckets=512, emb_size=128, max_len=16, batch=16
    num_buckets, emb_size, max_len, batch = 512, 128, 16, 16

    emb_table = 0.1 * jax.random.normal(k_tab, (num_buckets, emb_size), jnp.float32)
    emb_table = emb_table.at[0].set(0.0)            # nn.Embedding(padding_idx=0)

    scale = 1.0 / float(jnp.sqrt(jnp.float32(emb_size)))
    w_ih_t = scale * jax.random.normal(k_wih, (emb_size, 4 * emb_size), jnp.float32)
    w_hh_t = scale * jax.random.normal(k_whh, (emb_size, 4 * emb_size), jnp.float32)
    bias = 0.1 * jax.random.normal(k_b, (4 * emb_size,), jnp.float32)
    gamma = jnp.ones((emb_size,), jnp.float32)      # LayerNorm weight at init
    beta = jnp.zeros((emb_size,), jnp.float32)      # LayerNorm bias at init

    ids = jax.random.randint(k_ids, (batch, max_len), 0, num_buckets, dtype=jnp.int32)

    out = docstring_embedder_forward(ids, emb_table, w_ih_t, w_hh_t, bias, gamma, beta,
                                     block_b=8)
    jax.block_until_ready(out)

    ref = reference_forward(ids, emb_table, w_ih_t, w_hh_t, bias, gamma, beta)
    assert out.shape == (batch, emb_size) and out.dtype == jnp.float32
    assert jnp.allclose(out, ref, atol=1e-4, rtol=1e-4), float(jnp.abs(out - ref).max())

    print("KERNEL_OK")
</pallas_src>

<mosaic_0001>
module attributes {stable_mosaic.version = 11 : i64} {
  func.func @docstring_embedder_kernel(%arg0: i32, %arg1: memref<16x16xi32, #tpu.memory_space<smem>>, %arg2: memref<512x128xf32, #tpu.memory_space<vmem>>, %arg3: memref<128x512xf32, #tpu.memory_space<vmem>>, %arg4: memref<128x512xf32, #tpu.memory_space<vmem>>, %arg5: memref<1x512xf32, #tpu.memory_space<vmem>>, %arg6: memref<1x128xf32, #tpu.memory_space<vmem>>, %arg7: memref<1x128xf32, #tpu.memory_space<vmem>>, %arg8: memref<8x128xf32, #tpu.memory_space<vmem>>, %arg9: memref<8x128xf32, #tpu.memory_space<vmem>>, %arg10: memref<8x128xf32, #tpu.memory_space<vmem>>, %arg11: memref<8x128xf32, #tpu.memory_space<vmem>>, %arg12: memref<8x128xf32, #tpu.memory_space<vmem>>) attributes {dimension_semantics = [#tpu.dimension_semantics<parallel>], iteration_bounds = array<i64: 2>, scalar_prefetch = 1 : i64, scratch_operands = 4 : i64, tpu.core_type = #tpu.core_type<tc>, window_params = [{pipeline_mode = #tpu.pipeline_mode<synchronous>, transform_indices = @transform_0, window_bounds = array<i64: 512, 128>}, {pipeline_mode = #tpu.pipeline_mode<synchronous>, transform_indices = @transform_1, window_bounds = array<i64: 128, 512>}, {pipeline_mode = #tpu.pipeline_mode<synchronous>, transform_indices = @transform_2, window_bounds = array<i64: 128, 512>}, {pipeline_mode = #tpu.pipeline_mode<synchronous>, transform_indices = @transform_3, window_bounds = array<i64: 1, 512>}, {pipeline_mode = #tpu.pipeline_mode<synchronous>, transform_indices = @transform_4, window_bounds = array<i64: 1, 128>}, {pipeline_mode = #tpu.pipeline_mode<synchronous>, transform_indices = @transform_5, window_bounds = array<i64: 1, 128>}, {transform_indices = @transform_6, window_bounds = array<i64: 8, 128>}]} {
    %c8_i32 = arith.constant 8 : i32
    %0 = arith.muli %arg0, %c8_i32 : i32
    %cst = arith.constant 0.000000e+00 : f32
    %1 = vector.broadcast %cst : f32 to vector<8x128xf32>
    %c0 = arith.constant 0 : index
    %c0_0 = arith.constant 0 : index
    %2 = vector.load %arg10[%c0, %c0_0] : memref<8x128xf32, #tpu.memory_space<vmem>>, vector<8x128xf32>
    tpu.vector_store %arg10[%c0, %c0_0], %1 {strides = array<i32>} : memref<8x128xf32, #tpu.memory_space<vmem>>, vector<8x128xf32>,
    %cst_1 = arith.constant 0.000000e+00 : f32
    %3 = vector.broadcast %cst_1 : f32 to vector<8x128xf32>
    %c0_2 = arith.constant 0 : index
    %c0_3 = arith.constant 0 : index
    %4 = vector.load %arg11[%c0_2, %c0_3] : memref<8x128xf32, #tpu.memory_space<vmem>>, vector<8x128xf32>
    tpu.vector_store %arg11[%c0_2, %c0_3], %3 {strides = array<i32>} : memref<8x128xf32, #tpu.memory_space<vmem>>, vector<8x128xf32>,
    %cst_4 = arith.constant 0.000000e+00 : f32
    %5 = vector.broadcast %cst_4 : f32 to vector<8x128xf32>
    %c0_5 = arith.constant 0 : index
    %c0_6 = arith.constant 0 : index
    %6 = vector.load %arg12[%c0_5, %c0_6] : memref<8x128xf32, #tpu.memory_space<vmem>>, vector<8x128xf32>
    tpu.vector_store %arg12[%c0_5, %c0_6], %5 {strides = array<i32>} : memref<8x128xf32, #tpu.memory_space<vmem>>, vector<8x128xf32>,
    %c0_i32 = arith.constant 0 : i32
    %c16_i32 = arith.constant 16 : i32
    %7 = arith.addi %c0_i32, %c16_i32 : i32
    %c1_i32 = arith.constant 1 : i32
    scf.for %arg13 = %c0_i32 to %7 step %c1_i32  : i32 {
      %c0_i32_22 = arith.constant 0 : i32
      %36 = arith.addi %0, %c0_i32_22 : i32
      %37 = arith.index_cast %36 : i32 to index
      %38 = arith.index_cast %arg13 : i32 to index
      %39 = memref.load %arg1[%37, %38] : memref<16x16xi32, #tpu.memory_space<smem>>
      %40 = arith.index_cast %39 : i32 to index
      %c0_23 = arith.constant 0 : index
      %41 = vector.load %arg2[%40, %c0_23] : memref<512x128xf32, #tpu.memory_space<vmem>>, vector<1x128xf32>
      %c0_24 = arith.constant 0 : index
      %c0_25 = arith.constant 0 : index
      %42 = vector.load %arg9[%c0_24, %c0_25] : memref<8x128xf32, #tpu.memory_space<vmem>>, vector<1x128xf32>
      tpu.vector_store %arg9[%c0_24, %c0_25], %41 {strides = array<i32>} : memref<8x128xf32, #tpu.memory_space<vmem>>, vector<1x128xf32>,
      %c1_i32_26 = arith.constant 1 : i32
      %43 = arith.addi %0, %c1_i32_26 : i32
      %44 = arith.index_cast %43 : i32 to index
      %45 = arith.index_cast %arg13 : i32 to index
      %46 = memref.load %arg1[%44, %45] : memref<16x16xi32, #tpu.memory_space<smem>>
      %47 = arith.index_cast %46 : i32 to index
      %c0_27 = arith.constant 0 : index
      %48 = vector.load %arg2[%47, %c0_27] : memref<512x128xf32, #tpu.memory_space<vmem>>, vector<1x128xf32>
      %c1 = arith.constant 1 : index
      %c0_28 = arith.constant 0 : index
      %49 = vector.load %arg9[%c1, %c0_28] : memref<8x128xf32, #tpu.memory_space<vmem>>, vector<1x128xf32>
      tpu.vector_store %arg9[%c1, %c0_28], %48 {strides = array<i32>} : memref<8x128xf32, #tpu.memory_space<vmem>>, vector<1x128xf32>,
      %c2_i32 = arith.constant 2 : i32
      %50 = arith.addi %0, %c2_i32 : i32
      %51 = arith.index_cast %50 : i32 to index
      %52 = arith.index_cast %arg13 : i32 to index
      %53 = memref.load %arg1[%51, %52] : memref<16x16xi32, #tpu.memory_space<smem>>
      %54 = arith.index_cast %53 : i32 to index
      %c0_29 = arith.constant 0 : index
      %55 = vector.load %arg2[%54, %c0_29] : memref<512x128xf32, #tpu.memory_space<vmem>>, vector<1x128xf32>
      %c2 = arith.constant 2 : index
      %c0_30 = arith.constant 0 : index
      %56 = vector.load %arg9[%c2, %c0_30] : memref<8x128xf32, #tpu.memory_space<vmem>>, vector<1x128xf32>
      tpu.vector_store %arg9[%c2, %c0_30], %55 {strides = array<i32>} : memref<8x128xf32, #tpu.memory_space<vmem>>, vector<1x128xf32>,
      %c3_i32 = arith.constant 3 : i32
      %57 = arith.addi %0, %c3_i32 : i32
      %58 = arith.index_cast %57 : i32 to index
      %59 = arith.index_cast %arg13 : i32 to index
      %60 = memref.load %arg1[%58, %59] : memref<16x16xi32, #tpu.memory_space<smem>>
      %61 = arith.index_cast %60 : i32 to index
      %c0_31 = arith.constant 0 : index
      %62 = vector.load %arg2[%61, %c0_31] : memref<512x128xf32, #tpu.memory_space<vmem>>, vector<1x128xf32>
      %c3 = arith.constant 3 : index
      %c0_32 = arith.constant 0 : index
      %63 = vector.load %arg9[%c3, %c0_32] : memref<8x128xf32, #tpu.memory_space<vmem>>, vector<1x128xf32>
      tpu.vector_store %arg9[%c3, %c0_32], %62 {strides = array<i32>} : memref<8x128xf32, #tpu.memory_space<vmem>>, vector<1x128xf32>,
      %c4_i32 = arith.constant 4 : i32
      %64 = arith.addi %0, %c4_i32 : i32
      %65 = arith.index_cast %64 : i32 to index
      %66 = arith.index_cast %arg13 : i32 to index
      %67 = memref.load %arg1[%65, %66] : memref<16x16xi32, #tpu.memory_space<smem>>
      %68 = arith.index_cast %67 : i32 to index
      %c0_33 = arith.constant 0 : index
      %69 = vector.load %arg2[%68, %c0_33] : memref<512x128xf32, #tpu.memory_space<vmem>>, vector<1x128xf32>
      %c4 = arith.constant 4 : index
      %c0_34 = arith.constant 0 : index
      %70 = vector.load %arg9[%c4, %c0_34] : memref<8x128xf32, #tpu.memory_space<vmem>>, vector<1x128xf32>
      tpu.vector_store %arg9[%c4, %c0_34], %69 {strides = array<i32>} : memref<8x128xf32, #tpu.memory_space<vmem>>, vector<1x128xf32>,
      %c5_i32 = arith.constant 5 : i32
      %71 = arith.addi %0, %c5_i32 : i32
      %72 = arith.index_cast %71 : i32 to index
      %73 = arith.index_cast %arg13 : i32 to index
      %74 = memref.load %arg1[%72, %73] : memref<16x16xi32, #tpu.memory_space<smem>>
      %75 = arith.index_cast %74 : i32 to index
      %c0_35 = arith.constant 0 : index
      %76 = vector.load %arg2[%75, %c0_35] : memref<512x128xf32, #tpu.memory_space<vmem>>, vector<1x128xf32>
      %c5 = arith.constant 5 : index
      %c0_36 = arith.constant 0 : index
      %77 = vector.load %arg9[%c5, %c0_36] : memref<8x128xf32, #tpu.memory_space<vmem>>, vector<1x128xf32>
      tpu.vector_store %arg9[%c5, %c0_36], %76 {strides = array<i32>} : memref<8x128xf32, #tpu.memory_space<vmem>>, vector<1x128xf32>,
      %c6_i32 = arith.constant 6 : i32
      %78 = arith.addi %0, %c6_i32 : i32
      %79 = arith.index_cast %78 : i32 to index
      %80 = arith.index_cast %arg13 : i32 to index
      %81 = memref.load %arg1[%79, %80] : memref<16x16xi32, #tpu.memory_space<smem>>
      %82 = arith.index_cast %81 : i32 to index
      %c0_37 = arith.constant 0 : index
      %83 = vector.load %arg2[%82, %c0_37] : memref<512x128xf32, #tpu.memory_space<vmem>>, vector<1x128xf32>
      %c6 = arith.constant 6 : index
      %c0_38 = arith.constant 0 : index
      %84 = vector.load %arg9[%c6, %c0_38] : memref<8x128xf32, #tpu.memory_space<vmem>>, vector<1x128xf32>
      tpu.vector_store %arg9[%c6, %c0_38], %83 {strides = array<i32>} : memref<8x128xf32, #tpu.memory_space<vmem>>, vector<1x128xf32>,
      %c7_i32 = arith.constant 7 : i32
      %85 = arith.addi %0, %c7_i32 : i32
      %86 = arith.index_cast %85 : i32 to index
      %87 = arith.index_cast %arg13 : i32 to index
      %88 = memref.load %arg1[%86, %87] : memref<16x16xi32, #tpu.memory_space<smem>>
      %89 = arith.index_cast %88 : i32 to index
      %c0_39 = arith.constant 0 : index
      %90 = vector.load %arg2[%89, %c0_39] : memref<512x128xf32, #tpu.memory_space<vmem>>, vector<1x128xf32>
      %c7 = arith.constant 7 : index
      %c0_40 = arith.constant 0 : index
      %91 = vector.load %arg9[%c7, %c0_40] : memref<8x128xf32, #tpu.memory_space<vmem>>, vector<1x128xf32>
      tpu.vector_store %arg9[%c7, %c0_40], %90 {strides = array<i32>} : memref<8x128xf32, #tpu.memory_space<vmem>>, vector<1x128xf32>,
      %c0_41 = arith.constant 0 : index
      %c0_42 = arith.constant 0 : index
      %92 = vector.load %arg9[%c0_41, %c0_42] : memref<8x128xf32, #tpu.memory_space<vmem>>, vector<8x128xf32>
      %c0_43 = arith.constant 0 : index
      %c0_44 = arith.constant 0 : index
      %93 = vector.load %arg3[%c0_43, %c0_44] : memref<128x512xf32, #tpu.memory_space<vmem>>, vector<128x512xf32>
      %cst_45 = arith.constant dense<0.000000e+00> : vector<8x512xf32>
      %94 = tpu.matmul %92, %93, %cst_45 {dimension_numbers = #tpu.dot_dimension_numbers<[1], [0], [0], [1], [0, 0, 1, 1], [], []>} : vector<8x128xf32>, vector<128x512xf32>, vector<8x512xf32> -> vector<8x512xf32>
      %c0_46 = arith.constant 0 : index
      %c0_47 = arith.constant 0 : index
      %95 = vector.load %arg10[%c0_46, %c0_47] : memref<8x128xf32, #tpu.memory_space<vmem>>, vector<8x128xf32>
      %c0_48 = arith.constant 0 : index
      %c0_49 = arith.constant 0 : index
      %96 = vector.load %arg4[%c0_48, %c0_49] : memref<128x512xf32, #tpu.memory_space<vmem>>, vector<128x512xf32>
      %cst_50 = arith.constant dense<0.000000e+00> : vector<8x512xf32>
      %97 = tpu.matmul %95, %96, %cst_50 {dimension_numbers = #tpu.dot_dimension_numbers<[1], [0], [0], [1], [0, 0, 1, 1], [], []>} : vector<8x128xf32>, vector<128x512xf32>, vector<8x512xf32> -> vector<8x512xf32>
      %98 = arith.addf %94, %97 : vector<8x512xf32>
      %c0_51 = arith.constant 0 : index
      %c0_52 = arith.constant 0 : index
      %99 = vector.load %arg5[%c0_51, %c0_52] : memref<1x512xf32, #tpu.memory_space<vmem>>, vector<1x512xf32>
      %100 = vector.broadcast %99 : vector<1x512xf32> to vector<8x512xf32>
      %101 = arith.addf %98, %100 : vector<8x512xf32>
      %102 = vector.extract_strided_slice %101 {offsets = [0, 0], sizes = [8, 128], strides = [1, 1]} : vector<8x512xf32> to vector<8x128xf32>
      %cst_53 = arith.constant 0.000000e+00 : f32
      %103 = vector.broadcast %cst_53 : f32 to vector<8x128xf32>
      %104 = arith.subf %103, %102 : vector<8x128xf32>
      %105 = math.exp %104 : vector<8x128xf32>
      %cst_54 = arith.constant 1.000000e+00 : f32
      %106 = vector.broadcast %cst_54 : f32 to vector<8x128xf32>
      %107 = arith.addf %106, %105 : vector<8x128xf32>
      %cst_55 = arith.constant 1.000000e+00 : f32
      %108 = vector.broadcast %cst_55 : f32 to vector<8x128xf32>
      %109 = arith.divf %108, %107 : vector<8x128xf32>
      %110 = vector.extract_strided_slice %101 {offsets = [0, 128], sizes = [8, 128], strides = [1, 1]} : vector<8x512xf32> to vector<8x128xf32>
      %cst_56 = arith.constant 0.000000e+00 : f32
      %111 = vector.broadcast %cst_56 : f32 to vector<8x128xf32>
      %112 = arith.subf %111, %110 : vector<8x128xf32>
      %113 = math.exp %112 : vector<8x128xf32>
      %cst_57 = arith.constant 1.000000e+00 : f32
      %114 = vector.broadcast %cst_57 : f32 to vector<8x128xf32>
      %115 = arith.addf %114, %113 : vector<8x128xf32>
      %cst_58 = arith.constant 1.000000e+00 : f32
      %116 = vector.broadcast %cst_58 : f32 to vector<8x128xf32>
      %117 = arith.divf %116, %115 : vector<8x128xf32>
      %118 = vector.extract_strided_slice %101 {offsets = [0, 256], sizes = [8, 128], strides = [1, 1]} : vector<8x512xf32> to vector<8x128xf32>
      %119 = math.tanh %118 : vector<8x128xf32>
      %120 = vector.extract_strided_slice %101 {offsets = [0, 384], sizes = [8, 128], strides = [1, 1]} : vector<8x512xf32> to vector<8x128xf32>
      %cst_59 = arith.constant 0.000000e+00 : f32
      %121 = vector.broadcast %cst_59 : f32 to vector<8x128xf32>
      %122 = arith.subf %121, %120 : vector<8x128xf32>
      %123 = math.exp %122 : vector<8x128xf32>
      %cst_60 = arith.constant 1.000000e+00 : f32
      %124 = vector.broadcast %cst_60 : f32 to vector<8x128xf32>
      %125 = arith.addf %124, %123 : vector<8x128xf32>
      %cst_61 = arith.constant 1.000000e+00 : f32
      %126 = vector.broadcast %cst_61 : f32 to vector<8x128xf32>
      %127 = arith.divf %126, %125 : vector<8x128xf32>
      %c0_62 = arith.constant 0 : index
      %c0_63 = arith.constant 0 : index
      %128 = vector.load %arg11[%c0_62, %c0_63] : memref<8x128xf32, #tpu.memory_space<vmem>>, vector<8x128xf32>
      %129 = arith.mulf %117, %128 : vector<8x128xf32>
      %130 = arith.mulf %109, %119 : vector<8x128xf32>
      %131 = arith.addf %129, %130 : vector<8x128xf32>
      %132 = math.tanh %131 : vector<8x128xf32>
      %133 = arith.mulf %127, %132 : vector<8x128xf32>
      %c0_64 = arith.constant 0 : index
      %c0_65 = arith.constant 0 : index
      %134 = vector.load %arg11[%c0_64, %c0_65] : memref<8x128xf32, #tpu.memory_space<vmem>>, vector<8x128xf32>
      tpu.vector_store %arg11[%c0_64, %c0_65], %131 {strides = array<i32>} : memref<8x128xf32, #tpu.memory_space<vmem>>, vector<8x128xf32>,
      %c0_66 = arith.constant 0 : index
      %c0_67 = arith.constant 0 : index
      %135 = vector.load %arg10[%c0_66, %c0_67] : memref<8x128xf32, #tpu.memory_space<vmem>>, vector<8x128xf32>
      tpu.vector_store %arg10[%c0_66, %c0_67], %133 {strides = array<i32>} : memref<8x128xf32, #tpu.memory_space<vmem>>, vector<8x128xf32>,
      %c0_68 = arith.constant 0 : index
      %c0_69 = arith.constant 0 : index
      %136 = vector.load %arg12[%c0_68, %c0_69] : memref<8x128xf32, #tpu.memory_space<vmem>>, vector<8x128xf32>
      %137 = arith.addf %136, %133 : vector<8x128xf32>
      %c0_70 = arith.constant 0 : index
      %c0_71 = arith.constant 0 : index
      %138 = vector.load %arg12[%c0_70, %c0_71] : memref<8x128xf32, #tpu.memory_space<vmem>>, vector<8x128xf32>
      tpu.vector_store %arg12[%c0_70, %c0_71], %137 {strides = array<i32>} : memref<8x128xf32, #tpu.memory_space<vmem>>, vector<8x128xf32>,
    }
    %c16_i32_7 = arith.constant 16 : i32
    %c0_8 = arith.constant 0 : index
    %c0_9 = arith.constant 0 : index
    %8 = vector.load %arg12[%c0_8, %c0_9] : memref<8x128xf32, #tpu.memory_space<vmem>>, vector<8x128xf32>
    %cst_10 = arith.constant 6.250000e-02 : f32
    %9 = vector.broadcast %cst_10 : f32 to vector<8x128xf32>
    %10 = arith.mulf %8, %9 : vector<8x128xf32>
    %cst_11 = arith.constant dense<0.000000e+00> : vector<8xf32>
    %11 = vector.multi_reduction <add>, %10, %cst_11 [1] : vector<8x128xf32> to vector<8xf32>
    %12 = vector.shape_cast %11 : vector<8xf32> to vector<8x1xf32>
    %cst_12 = arith.constant 7.812500e-03 : f32
    %13 = vector.broadcast %cst_12 : f32 to vector<8x1xf32>
    %14 = arith.mulf %12, %13 : vector<8x1xf32>
    %15 = arith.mulf %10, %10 : vector<8x128xf32>
    %cst_13 = arith.constant dense<0.000000e+00> : vector<8xf32>
    %16 = vector.multi_reduction <add>, %15, %cst_13 [1] : vector<8x128xf32> to vector<8xf32>
    %17 = vector.shape_cast %16 : vector<8xf32> to vector<8x1xf32>
    %cst_14 = arith.constant 7.812500e-03 : f32
    %18 = vector.broadcast %cst_14 : f32 to vector<8x1xf32>
    %19 = arith.mulf %17, %18 : vector<8x1xf32>
    %20 = arith.mulf %14, %14 : vector<8x1xf32>
    %21 = arith.subf %19, %20 : vector<8x1xf32>
    %22 = vector.broadcast %14 : vector<8x1xf32> to vector<8x128xf32>
    %23 = arith.subf %10, %22 : vector<8x128xf32>
    %cst_15 = arith.constant 9.99999974E-6 : f32
    %24 = vector.broadcast %cst_15 : f32 to vector<8x1xf32>
    %25 = arith.addf %21, %24 : vector<8x1xf32>
    %26 = math.rsqrt %25 : vector<8x1xf32>
    %27 = vector.broadcast %26 : vector<8x1xf32> to vector<8x128xf32>
    %28 = arith.mulf %23, %27 : vector<8x128xf32>
    %c0_16 = arith.constant 0 : index
    %c0_17 = arith.constant 0 : index
    %29 = vector.load %arg6[%c0_16, %c0_17] : memref<1x128xf32, #tpu.memory_space<vmem>>, vector<1x128xf32>
    %30 = vector.broadcast %29 : vector<1x128xf32> to vector<8x128xf32>
    %31 = arith.mulf %28, %30 : vector<8x128xf32>
    %c0_18 = arith.constant 0 : index
    %c0_19 = arith.constant 0 : index
    %32 = vector.load %arg7[%c0_18, %c0_19] : memref<1x128xf32, #tpu.memory_space<vmem>>, vector<1x128xf32>
    %33 = vector.broadcast %32 : vector<1x128xf32> to vector<8x128xf32>
    %34 = arith.addf %31, %33 : vector<8x128xf32>
    %c0_20 = arith.constant 0 : index
    %c0_21 = arith.constant 0 : index
    %35 = vector.load %arg8[%c0_20, %c0_21] : memref<8x128xf32, #tpu.memory_space<vmem>>, vector<8x128xf32>
    tpu.vector_store %arg8[%c0_20, %c0_21], %34 {strides = array<i32>} : memref<8x128xf32, #tpu.memory_space<vmem>>, vector<8x128xf32>,
    return
  }
  func.func @transform_0(%arg0: i32, %arg1: memref<16x16xi32, #tpu.memory_space<smem>>) -> (i32, i32) {
    %c0_i32 = arith.constant 0 : i32
    %c0_i32_0 = arith.constant 0 : i32
    %c0_i32_1 = arith.constant 0 : i32
    return %c0_i32, %c0_i32_0 : i32, i32
  }
  func.func @transform_1(%arg0: i32, %arg1: memref<16x16xi32, #tpu.memory_space<smem>>) -> (i32, i32) {
    %c0_i32 = arith.constant 0 : i32
    %c0_i32_0 = arith.constant 0 : i32
    %c0_i32_1 = arith.constant 0 : i32
    return %c0_i32, %c0_i32_0 : i32, i32
  }
  func.func @transform_2(%arg0: i32, %arg1: memref<16x16xi32, #tpu.memory_space<smem>>) -> (i32, i32) {
    %c0_i32 = arith.constant 0 : i32
    %c0_i32_0 = arith.constant 0 : i32
    %c0_i32_1 = arith.constant 0 : i32
    return %c0_i32, %c0_i32_0 : i32, i32
  }
  func.func @transform_3(%arg0: i32, %arg1: memref<16x16xi32, #tpu.memory_space<smem>>) -> (i32, i32) {
    %c0_i32 = arith.constant 0 : i32
    %c0_i32_0 = arith.constant 0 : i32
    %c0_i32_1 = arith.constant 0 : i32
    return %c0_i32, %c0_i32_0 : i32, i32
  }
  func.func @transform_4(%arg0: i32, %arg1: memref<16x16xi32, #tpu.memory_space<smem>>) -> (i32, i32) {
    %c0_i32 = arith.constant 0 : i32
    %c0_i32_0 = arith.constant 0 : i32
    %c0_i32_1 = arith.constant 0 : i32
    return %c0_i32, %c0_i32_0 : i32, i32
  }
  func.func @transform_5(%arg0: i32, %arg1: memref<16x16xi32, #tpu.memory_space<smem>>) -> (i32, i32) {
    %c0_i32 = arith.constant 0 : i32
    %c0_i32_0 = arith.constant 0 : i32
    %c0_i32_1 = arith.constant 0 : i32
    return %c0_i32, %c0_i32_0 : i32, i32
  }
  func.func @transform_6(%arg0: i32, %arg1: memref<16x16xi32, #tpu.memory_space<smem>>) -> (i32, i32) {
    %c0_i32 = arith.constant 0 : i32
    %c0_i32_0 = arith.constant 0 : i32
    return %arg0, %c0_i32 : i32, i32
  }
}

</mosaic_0001>

<bundles_post_ra>
// kernel: tpu_custom_call.1
= control target key start
LH: loop header
LB: loop body
LE: loop exit
PB: predicated region body
PF: predicated region fallthrough
CT: control target
= control target key end

     0   :  { %s1763_s0 = inlined_call_operand.hbm [shape: s32[16,16], index: 0, kind: input, shape index: {}]   ;;  %s1764_s1 = inlined_call_operand.hbm [shape: f32[512,128], index: 1, kind: input, shape index: {}]   ;;  %s1765_s2 = inlined_call_operand.hbm [shape: f32[128,512], index: 2, kind: input, shape index: {}]   ;;  %s1766_s3 = inlined_call_operand.hbm [shape: f32[128,512], index: 3, kind: input, shape index: {}]   ;;  %s1767_s4 = inlined_call_operand.vmem [shape: f32[1,512], index: 4, kind: input, shape index: {}]   ;;  %s1768_s5 = inlined_call_operand.vmem [shape: f32[1,128], index: 5, kind: input, shape index: {}]   ;;  %s1769_s6 = inlined_call_operand.vmem [shape: f32[1,128], index: 6, kind: input, shape index: {}]   ;;  %s1770_s7 = inlined_call_operand.hbm [shape: f32[16,128], index: 7, kind: output, shape index: {}]  }
   0x1   :  { %1778 = sst [smem:[#allocation21_spill]] %s1764_s1  ;;  %s1223_s26 = scalar_lea.hbm %s1763_s0, 256 }
   0x2   :  { %1779 = sst [smem:[#allocation22_spill]] %s1765_s2  ;;  %p1224_p0 = scmp.ne.s32.totalorder %s1763_s0, %s1223_s26 }
   0x3   :  { %1780 = sst [smem:[#allocation23_spill]] %s1766_s3  ;;  %p1227_p1 = scmp.lt.u32.totalorder %s1223_s26, %s1763_s0 }
   0x5   :  { %p1229_p2 = pnand %p1227_p1, %p1224_p0 }
   0x7   :  { %1232 = shalt.err (!%p1229_p2)  }
   0x8   :  { %s1399_s8 = smov [#allocation7]  }
   0x9   :  { %13 = dma.hbm_to_smem %s1763_s0, 256, %s1399_s8, [#allocation6] }
   0xa   :  { %1365 = dma.done.wait [#allocation6], 256 }
   0xb   :  { %1366 = vsyncadd [#allocation6], 4294967040 }
   0xc   :  { %15 = sfence }
   0xd   :  { %16 = vsyncpa [#allocation9], 0 }
   0xe   :  { %17 = vsyncpa [#allocation12], 0 }
   0xf   :  { %18 = vsyncpa [#allocation10], 0 }
  0x10   :  { %20 = vsyncpa [#allocation10 + $0x1], 0  ;;  %s1462_s11 = smov 0   ;;  %s1464_s12 = smov 0  }
  0x11   :  { %s1466_s13 = smov 0   ;;  %s1468_s14 = smov 0  }
  0x12 LB: > { %s1483_s0 = sadd.s32 4294967295, %s1393_s14   ;;  %s963_s15 = sadd.s32 4294967294, %s1393_s14   ;;  %s1393_s14 = sphi %s1468_s14, %s1808_s14   ;;  %s1389_s13 = sphi %s1466_s13, %s1807_s13   ;;  %s1385_s12 = sphi %s1464_s12, %s1806_s12   ;;  %s1381_s11 = sphi %s1462_s11, %s1805_s11  }
  0x13   : > { %s1487_s16 = sadd.s32 1, %s1393_s14   ;;  %s159_s17 = sadd.s32 1, %s1389_s13 }
  0x14   : > { %s156_s18 = ssub.s32 %s1393_s14, %s1487_s16  ;;  %p169_p3 = scmp.ne.s32.totalorder %s1389_s13, %s1385_s12 }
  0x15   : > { %p157_p4 = scmp.eq.s32.totalorder %s156_s18, 0  ;;  %p170_p5 = scmp.eq.s32.totalorder %s1483_s0, 1 }
  0x16   : > { %p175_p6 = scmp.ne.s32.totalorder %s1385_s12, %s1381_s11  ;;  %p176_p7 = scmp.eq.s32.totalorder %s963_s15, 1 }
  0x17   : > { %s1498_s19 = scalar_select %p157_p4, %s1389_s13, %s159_s17  }
  0x18   : > { %p1500_p8 = por %p170_p5, %p169_p3  ;;  %p1504_p9 = por %p176_p7, %p175_p6 }
  0x19   : > { %1781 = sst [smem:[#allocation19_spill]] %s1498_s19  ;;  %p964_p10 = scmp.ge.s32.totalorder %s1393_s14, 1 }
  0x1a   : > { %s1782_s20 = scalar_select %p1500_p8, 1, 0 }
  0x1b   : > { %s1783_s21 = scalar_select %p1504_p9, 1, 0 }
  0x1c   : > { %p183_p11 = scmp.lt.s32.totalorder %s1393_s14, 3  ;;  %p1771_p12 = scmp.eq.s32.totalorder %s1483_s0, 0 }
  0x1d   : > { %s1400_s23 = smov [#allocation11]   ;;  %s1401_s26 = smov [#allocation8]  }
  0x1e   : > { %p1511_p13 = pnand %p964_p10, %p183_p11  ;;  %s208_s24 = sshll.u32 %s1400_s23, 4  ;;  %s209_s24 = int_to_ptr.vmem [resolvable:$true] %s208_s24 }
  0x1f   : > { %s195_s27 = sshll.u32 %s1401_s26, 4  ;;  %s1786_s2 = sld [smem:[#allocation22_spill]]  ;;  %s1523_s27 = int_to_ptr.vmem [resolvable:$true] %s195_s27 }
  0x20   : > { %s1784_s22 = scalar_select %p1511_p13, 1, 0 }
  0x21   : > { %p1134_p0 = pneg %p1511_p13 }
  0x23   : > { %p1519_p1 = pnand %p1771_p12, %p1134_p0 }
  0x25   : > { %s1233_s30 = scalar_lea.hbm %s1786_s2, 8192  ;;  %p1533_p3 = pneg %p1519_p1 }
  0x26   : > { %p1234_p2 = scmp.ne.s32.totalorder %s1786_s2, %s1233_s30  ;;  %p1240_p6 = scmp.lt.u32.totalorder %s1233_s30, %s1786_s2 }
  0x28   : > { %p1236_p4 = pnand %p1533_p3, %p1234_p2 }
  0x2a   : > { %p1237_p5 = pneg %p1236_p4 }
  0x2c   : > { %p1242_p7 = pnand %p1240_p6, %p1237_p5 }
  0x2e   : > { %1245 = shalt.err (!%p1242_p7)
}
  0x2f   : > { %s1246_s18 = scalar_lea.vmem %s209_s24, 8192  ;;  %p1254_p12 = scmp.lt.s32.totalorder %s209_s24, %s209_s24 }
  0x30   : > { %p1247_p10 = scmp.ne.s32.totalorder %s209_s24, %s1246_s18  ;;  %p1255_p9 = scmp.lt.s32.totalorder %s1246_s18, %s1246_s18 }
  0x32   : > { %p1249_p11 = pnand %p1247_p10, %p1533_p3  ;;  %p1256_p8 = por %p1255_p9, %p1254_p12 }
  0x34   : > { %p1250_p0 = pneg %p1249_p11 }
  0x36   : > { %p1257_p13 = pnand %p1256_p8, %p1250_p0 }
  0x38   : > { %1260 = shalt.err (!%p1257_p13)
}
  0x39   : > { %s1774_s23 = smov 512   ;;  %s1775_s26 = smov 32  }
  0x3a   : > { %1140 = dma.hbm_to_vmem [thread:$0]  (!%p1519_p1), %s1786_s2, 8192, %s209_s24, [#allocation12], %s1774_s23, %s1774_s23, %s1775_s26  }
  0x3b   : > { %s1788_s1 = sld [smem:[#allocation21_spill]] }
  0x41   : > { %s1261_s9 = scalar_lea.hbm %s1788_s1, 8192 }
  0x42   : > { %p1262_p8 = scmp.ne.s32.totalorder %s1788_s1, %s1261_s9  ;;  %p1268_p13 = scmp.lt.u32.totalorder %s1261_s9, %s1788_s1 }
  0x44   : > { %p1264_p9 = pnand %p1262_p8, %p1533_p3 }
  0x46   : > { %p1265_p12 = pneg %p1264_p9 }
  0x48   : > { %p1270_p2 = pnand %p1268_p13, %p1265_p12 }
  0x4a   : > { %1273 = shalt.err (!%p1270_p2)
}
  0x4b   : > { %s1274_s24 = scalar_lea.vmem %s1523_s27, 8192  ;;  %p1282_p7 = scmp.lt.s32.totalorder %s1523_s27, %s1523_s27 }
  0x4c   : > { %p1275_p4 = scmp.ne.s32.totalorder %s1523_s27, %s1274_s24  ;;  %p1283_p10 = scmp.lt.s32.totalorder %s1274_s24, %s1274_s24 }
  0x4e   : > { %p1277_p5 = pnand %p1275_p4, %p1533_p3  ;;  %p1284_p11 = por %p1283_p10, %p1282_p7 }
  0x50   : > { %p1278_p6 = pneg %p1277_p5 }
  0x52   : > { %p1285_p0 = pnand %p1284_p11, %p1278_p6 }
  0x54   : > { %1288 = shalt.err (!%p1285_p0)
}
  0x55   : > { %s1404_s28 = smov 128   ;;  %s1405_s19 = smov 8  }
  0x56   : > { %1137 = dma.hbm_to_vmem [thread:$0]  (!%p1519_p1), %s1788_s1, 8192, %s1523_s27, [#allocation9], %s1404_s28, %s1404_s28, %s1405_s19  }
  0x57   : > { %s1406_s8 = smov [#allocation13]   ;;  %s1789_s3 = sld [smem:[#allocation23_spill]] }
  0x58   : > { %s221_s9 = sshll.u32 %s1406_s8, 4  ;;  %s222_s9 = int_to_ptr.vmem [resolvable:$true] %s221_s9 }
  0x5d   : > { %s1289_s18 = scalar_lea.hbm %s1789_s3, 8192 }
  0x5e   : > { %p1290_p8 = scmp.ne.s32.totalorder %s1789_s3, %s1289_s18  ;;  %p1296_p13 = scmp.lt.u32.totalorder %s1289_s18, %s1789_s3 }
  0x60   : > { %p1292_p9 = pnand %p1290_p8, %p1533_p3 }
  0x62   : > { %p1293_p12 = pneg %p1292_p9 }
  0x64   : > { %p1298_p2 = pnand %p1296_p13, %p1293_p12 }
  0x66   : > { %1301 = shalt.err (!%p1298_p2)
}
  0x67   : > { %s1302_s27 = scalar_lea.vmem %s222_s9, 8192  ;;  %p1310_p7 = scmp.lt.s32.totalorder %s222_s9, %s222_s9 }
  0x68   : > { %p1303_p4 = scmp.ne.s32.totalorder %s222_s9, %s1302_s27  ;;  %p1311_p10 = scmp.lt.s32.totalorder %s1302_s27, %s1302_s27 }
  0x6a   : > { %p1305_p5 = pnand %p1303_p4, %p1533_p3  ;;  %p1312_p11 = por %p1311_p10, %p1310_p7 }
  0x6c   : > { %p1306_p6 = pneg %p1305_p5 }
  0x6e   : > { %p1313_p0 = pnand %p1312_p11, %p1306_p6 }
  0x70   : > { %1316 = shalt.err (!%p1313_p0)
}
  0x71   : > { %s1790_s23 = smov 32   ;;  %s1791_s28 = smov 512  }
  0x72   : > { %1143 = dma.hbm_to_vmem [thread:$0]  (!%p1519_p1), %s1789_s3, 8192, %s222_s9, [#allocation12], %s1791_s28, %s1791_s28, %s1790_s23  }
  0x73   : > { %p1792_p8 = scmp.ne.s32.totalorder %s1784_s22, 0 }
  0x75   : > { %246 = sbr.rel (%p1792_p8) target bundleno = 656 (0x290), region = 44 }
  0x7c   : > { %p1793_p3 = scmp.eq.s32.totalorder %s1483_s0, 0 }
  0x7e   : > { %1368 = dma.done.wait (%p1793_p3), [#allocation9], 8192   ;;  %p1794_p9 = pmov %p1793_p3 }
  0x7f   : > { %p1795_p12 = pmov %p1793_p3 }
  0x80   : > { %1370 = vsyncadd (%p1794_p9), [#allocation9], 4294959104 }
  0x81   : > { %1372 = dma.done.wait (%p1795_p12), [#allocation12], 16384   ;;  %p1796_p13 = pmov %p1793_p3 }
  0x82   : > { %s1776_s25 = sand.u32 1, %s1385_s12   ;;  %s1608_s10 = sshll.u32 %s1483_s0, 3  ;;  %v1407_v0 = vmov 0.0  }
  0x83   : > { %1374 = vsyncadd (%p1796_p13), [#allocation12], 4294950912  ;;  %1797 = sst [smem:[#allocation20_spill]] %s1608_s10  ;;  %s1612_s22 = sshll.u32 %s1776_s25, 3  ;;  %280 = vst [vmem:[#allocation3] sm:$0xff] %v1407_v0 }
  0x84   : > { %281 = vst [vmem:[#allocation4] sm:$0xff] %v1407_v0  ;;  %282 = vst [vmem:[#allocation5] sm:$0xff] %v1407_v0  ;;  %s1615_s29 = smov 0  }
  0x85 LB: >> { %s1798_s10 = sld [smem:[#allocation20_spill]]  ;;  %v423_v1 = vld [vmem:[#allocation13 + $0x8] sm:$0xff]  ;;  %v425_v3 = vld [vmem:[#allocation13 + $0x18] sm:$0xff]  ;;  %v422_v6 = vld [vmem:[#allocation13] sm:$0xff]  ;;  %v1408_v8 = vmov 0.0   ;;  %s1623_s30 = sshra.s32 %s1397_s29, 7  ;;  %s1397_s29 = sphi %s1615_s29, %s288_s29  }
  0x86   : >> { %v427_v2 = vld [vmem:[#allocation13 + $0x28] sm:$0xff]  ;;  %v429_v5 = vld [vmem:[#allocation13 + $0x38] sm:$0xff]  ;;  %v426_v7 = vld [vmem:[#allocation13 + $0x20] sm:$0xff]  ;;  %550 = vmatprep.mubr.f32.mxu0 %v1408_v8  ;;  %621 = vmatprep.mubr.f32.mxu1 %v1408_v8  ;;  %s1632_s18 = sand.u32 127, %s1397_s29  ;;  %s288_s29 = sadd.s32 1, %s1397_s29  }
  0x87   : >> { %v988_v4 = vpack.c.bf16 %v427_v2, %v423_v1  ;;  %v1020_v9 = vpack.c.bf16 %v429_v5, %v425_v3  ;;  %v990_v10 = vpack.c.bf16 %v426_v7, %v422_v6  ;;  %v424_v11 = vld [vmem:[#allocation13 + $0x10] sm:$0xff]  ;;  %v431_v13 = vld [vmem:[#allocation13 + $0x48] sm:$0xff]  ;;  %v433_v16 = vld [vmem:[#allocation13 + $0x58] sm:$0xff]  ;;  %p285_p1 = scmp.ge.s32.totalorder %s288_s29, 16  }
  0x88   : >> { %v428_v12 = vld [vmem:[#allocation13 + $0x30] sm:$0xff]  ;;  %v435_v15 = vld [vmem:[#allocation13 + $0x68] sm:$0xff]  ;;  %v437_v17 = vld [vmem:[#allocation13 + $0x78] sm:$0xff]  ;;  %p1802_p4 = scmp.ne.s32.totalorder (%p285_p1), %s1782_s20, 0 }
  0x89   : >> { %989 = vmatprep.subr.bf16.mxu0 %v988_v4  ;;  %v1022_v14 = vpack.c.bf16 %v428_v12, %v424_v11  ;;  %1021 = vmatprep.subr.bf16.mxu1 %v1020_v9  ;;  %v992_v18 = vpack.c.bf16 %v435_v15, %v431_v13  ;;  %v1024_v19 = vpack.c.bf16 %v437_v17, %v433_v16  ;;  %v430_v20 = vld [vmem:[#allocation13 + $0x40] sm:$0xff]  ;;  %v432_v22 = vld [vmem:[#allocation13 + $0x50] sm:$0xff]  ;;  %v439_v25 = vld [vmem:[#allocation13 + $0x88] sm:$0xff] }
  0x8a   : >> { %991 = vmatpush1.bf16.msra.mxu0 %v990_v10  ;;  %v434_v21 = vld [vmem:[#allocation13 + $0x60] sm:$0xff]  ;;  %v436_v24 = vld [vmem:[#allocation13 + $0x70] sm:$0xff]  ;;  %v443_v26 = vld [vmem:[#allocation13 + $0xa8] sm:$0xff] }
  0x8b   : >> { %1023 = vmatpush1.bf16.msra.mxu1 %v1022_v14  ;;  %v994_v23 = vpack.c.bf16 %v434_v21, %v430_v20  ;;  %993 = vmatprep.subr.bf16.mxu0 %v992_v18  ;;  %v1026_v27 = vpack.c.bf16 %v436_v24, %v432_v22  ;;  %v996_v28 = vpack.c.bf16 %v443_v26, %v439_v25  ;;  %v441_v29 = vld [vmem:[#allocation13 + $0x98] sm:$0xff]  ;;  %v438_v31 = vld [vmem:[#allocation13 + $0x80] sm:$0xff]  ;;  %v440_v34 = vld [vmem:[#allocation13 + $0x90] sm:$0xff]  ;;  %s300_s8 = sadd.s32 1, %s1798_s10  ;;  %s291_s9 = sadd.s32 %s1798_s10, %s1623_s30 }
  0x8c   : >> { %1025 = vmatprep.subr.bf16.mxu1 %v1024_v19  ;;  %v445_v30 = vld [vmem:[#allocation13 + $0xb8] sm:$0xff]  ;;  %v442_v33 = vld [vmem:[#allocation13 + $0xa0] sm:$0xff]  ;;  %v444_v35 = vld [vmem:[#allocation13 + $0xb0] sm:$0xff]  ;;  %s1629_s15 = sadd.s32 %s300_s8, %s1623_s30  ;;  %s974_s17 = sshll.u32 %s291_s9, 7 }
  0x8d   : >> { %v1028_v32 = vpack.c.bf16 %v445_v30, %v441_v29  ;;  %v998_v36 = vpack.c.bf16 %v442_v33, %v438_v31  ;;  %v447_v37 = vld [vmem:[#allocation13 + $0xc8] sm:$0xff]  ;;  %v449_v39 = vld [vmem:[#allocation13 + $0xd8] sm:$0xff]  ;;  %v1030_v40 = vpack.c.bf16 %v444_v35, %v440_v34  ;;  %v446_v43 = vld [vmem:[#allocation13 + $0xc0] sm:$0xff]  ;;  %s975_s24 = sshll.u32 %s1629_s15, 7  ;;  %s295_s27 = sadd.s32 %s974_s17, %s1632_s18 }
  0x8e   : >> { %995 = vmatpush1.bf16.msra.mxu0 %v994_v23  ;;  %v451_v38 = vld [vmem:[#allocation13 + $0xe8] sm:$0xff]  ;;  %v453_v42 = vld [vmem:[#allocation13 + $0xf8] sm:$0xff]  ;;  %v450_v44 = vld [vmem:[#allocation13 + $0xe0] sm:$0xff]  ;;  %s303_s23 = sadd.s32 %s975_s24, %s1632_s18  ;;  %s1637_s28 = sld [smem:[#allocation7 + %s295_s27]] }
  0x8f   : >> { %1027 = vmatpush1.bf16.msra.mxu1 %v1026_v27  ;;  %997 = vmatprep.subr.bf16.mxu0 %v996_v28  ;;  %v1000_v41 = vpack.c.bf16 %v451_v38, %v447_v37  ;;  %v1032_v45 = vpack.c.bf16 %v453_v42, %v449_v39  ;;  %v448_v46 = vld [vmem:[#allocation13 + $0xd0] sm:$0xff]  ;;  %v455_v48 = vld [vmem:[#allocation13 + $0x108] sm:$0xff]  ;;  %v457_v50 = vld [vmem:[#allocation13 + $0x118] sm:$0xff]  ;;  %v1002_v52 = vpack.c.bf16 %v450_v44, %v446_v43  ;;  %s308_s2 = sadd.s32 2, %s1798_s10  ;;  %s1640_s26 = sld [smem:[#allocation7 + %s303_s23]] }
  0x90   : >> { %1029 = vmatprep.subr.bf16.mxu1 %v1028_v32  ;;  %v452_v47 = vld [vmem:[#allocation13 + $0xf0] sm:$0xff]  ;;  %v459_v49 = vld [vmem:[#allocation13 + $0x128] sm:$0xff]  ;;  %v461_v51 = vld [vmem:[#allocation13 + $0x138] sm:$0xff]  ;;  %s316_s8 = sadd.s32 3, %s1798_s10  ;;  %s324_s9 = sadd.s32 4, %s1798_s10 }
  0x91   : >> { %v1034_v53 = vpack.c.bf16 %v452_v47, %v448_v46  ;;  %v1004_v54 = vpack.c.bf16 %v459_v49, %v455_v48  ;;  %v454_v55 = vld [vmem:[#allocation13 + $0x100] sm:$0xff]  ;;  %v456_v57 = vld [vmem:[#allocation13 + $0x110] sm:$0xff]  ;;  %v1036_v58 = vpack.c.bf16 %v461_v51, %v457_v50  ;;  %v463_v60 = vld [vmem:[#allocation13 + $0x148] sm:$0xff]  ;;  %s332_s15 = sadd.s32 5, %s1798_s10  ;;  %s340_s17 = sadd.s32 6, %s1798_s10 }
  0x92   : >> { %999 = vmatpush1.bf16.msra.mxu0 %v998_v36  ;;  %v458_v56 = vld [vmem:[#allocation13 + $0x120] sm:$0xff]  ;;  %v460_v59 = vld [vmem:[#allocation13 + $0x130] sm:$0xff]  ;;  %v467_v61 = vld [vmem:[#allocation13 + $0x168] sm:$0xff]  ;;  %s348_s24 = sadd.s32 7, %s1798_s10  ;;  %s1648_s27 = sadd.s32 %s308_s2, %s1623_s30 }
  0x93   : >> { %1031 = vmatpush1.bf16.msra.mxu1 %v1030_v40  ;;  %1001 = vmatprep.subr.bf16.mxu0 %v1000_v41  ;;  %v465_v62 = vld [vmem:[#allocation13 + $0x158] sm:$0xff]  ;;  %v1006_v0 = vpack.c.bf16 %v458_v56, %v454_v55  ;;  %v1038_v1 = vpack.c.bf16 %v460_v59, %v456_v57  ;;  %v1008_v2 = vpack.c.bf16 %v467_v61, %v463_v60  ;;  %v462_v3 = vld [vmem:[#allocation13 + $0x140] sm:$0xff]  ;;  %v464_v5 = vld [vmem:[#allocation13 + $0x150] sm:$0xff]  ;;  %s1651_s23 = sadd.s32 %s316_s8, %s1623_s30  ;;  %s1654_s25 = sadd.s32 %s324_s9, %s1623_s30 }
  0x94   : >> { %1033 = vmatprep.subr.bf16.mxu1 %v1032_v45  ;;  %v469_v63 = vld [vmem:[#allocation13 + $0x178] sm:$0xff]  ;;  %v466_v4 = vld [vmem:[#allocation13 + $0x160] sm:$0xff]  ;;  %v468_v7 = vld [vmem:[#allocation13 + $0x170] sm:$0xff]  ;;  %s1657_s19 = sadd.s32 %s332_s15, %s1623_s30  ;;  %s1660_s2 = sadd.s32 %s340_s17, %s1623_s30 }
  0x95   : >> { %v1040_v6 = vpack.c.bf16 %v469_v63, %v465_v62  ;;  %v471_v9 = vld [vmem:[#allocation13 + $0x188] sm:$0xff]  ;;  %v473_v11 = vld [vmem:[#allocation13 + $0x198] sm:$0xff]  ;;  %v1010_v13 = vpack.c.bf16 %v466_v4, %v462_v3  ;;  %v1042_v14 = vpack.c.bf16 %v468_v7, %v464_v5  ;;  %v470_v16 = vld [vmem:[#allocation13 + $0x180] sm:$0xff]  ;;  %s1663_s8 = sadd.s32 %s348_s24, %s1623_s30  ;;  %s976_s9 = sshll.u32 %s1648_s27, 7 }
  0x96   : >> { %1003 = vmatpush1.bf16.msra.mxu0 %v1002_v52  ;;  %v475_v10 = vld [vmem:[#allocation13 + $0x1a8] sm:$0xff]  ;;  %v477_v12 = vld [vmem:[#allocation13 + $0x1b8] sm:$0xff]  ;;  %v474_v17 = vld [vmem:[#allocation13 + $0x1a0] sm:$0xff]  ;;  %s977_s15 = sshll.u32 %s1651_s23, 7  ;;  %s978_s1 = sshll.u32 %s1654_s25, 7 }
  0x97   : >> { %1035 = vmatpush1.bf16.msra.mxu1 %v1034_v53  ;;  %1005 = vmatprep.subr.bf16.mxu0 %v1004_v54  ;;  %v1012_v15 = vpack.c.bf16 %v475_v10, %v471_v9  ;;  %v472_v18 = vld [vmem:[#allocation13 + $0x190] sm:$0xff]  ;;  %v1044_v19 = vpack.c.bf16 %v477_v12, %v473_v11  ;;  %v479_v21 = vld [vmem:[#allocation13 + $0x1c8] sm:$0xff]  ;;  %v481_v23 = vld [vmem:[#allocation13 + $0x1d8] sm:$0xff]  ;;  %v1014_v25 = vpack.c.bf16 %v474_v17, %v470_v16  ;;  %s979_s3 = sshll.u32 %s1657_s19, 7  ;;  %s980_s17 = sshll.u32 %s1660_s2, 7 }
  0x98   : >> { %1037 = vmatprep.subr.bf16.mxu1 %v1036_v58  ;;  %v476_v20 = vld [vmem:[#allocation13 + $0x1b0] sm:$0xff]  ;;  %v483_v22 = vld [vmem:[#allocation13 + $0x1e8] sm:$0xff]  ;;  %v485_v24 = vld [vmem:[#allocation13 + $0x1f8] sm:$0xff]  ;;  %s981_s30 = sshll.u32 %s1663_s8, 7  ;;  %s311_s24 = sadd.s32 %s976_s9, %s1632_s18 }
  0x99   : >> { %v1046_v26 = vpack.c.bf16 %v476_v20, %v472_v18  ;;  %v1016_v27 = vpack.c.bf16 %v483_v22, %v479_v21  ;;  %v478_v28 = vld [vmem:[#allocation13 + $0x1c0] sm:$0xff]  ;;  %v480_v30 = vld [vmem:[#allocation13 + $0x1d0] sm:$0xff]  ;;  %v1048_v31 = vpack.c.bf16 %v485_v24, %v481_v23  ;;  %v358_v33 = vld [vmem:[#allocation11 + $0x8] sm:$0xff]  ;;  %s319_s27 = sadd.s32 %s977_s15, %s1632_s18  ;;  %s327_s25 = sadd.s32 %s978_s1, %s1632_s18 }
  0x9a   : >> { %1007 = vmatpush1.bf16.msra.mxu0 %v1006_v0  ;;  %v482_v29 = vld [vmem:[#allocation13 + $0x1e0] sm:$0xff]  ;;  %v484_v32 = vld [vmem:[#allocation13 + $0x1f0] sm:$0xff]  ;;  %v362_v34 = vld [vmem:[#allocation11 + $0x28] sm:$0xff]  ;;  %s335_s19 = sadd.s32 %s979_s3, %s1632_s18  ;;  %s343_s23 = sadd.s32 %s980_s17, %s1632_s18 }
  0x9b   : >> { %1039 = vmatpush1.bf16.msra.mxu1 %v1038_v1  ;;  %1009 = vmatprep.subr.bf16.mxu0 %v1008_v2  ;;  %v360_v35 = vld [vmem:[#allocation11 + $0x18] sm:$0xff]  ;;  %v1018_v37 = vpack.c.bf16 %v482_v29, %v478_v28  ;;  %v1050_v38 = vpack.c.bf16 %v484_v32, %v480_v30  ;;  %v1052_v39 = vpack.c.bf16 %v362_v34, %v358_v33  ;;  %v357_v40 = vld [vmem:[#allocation11] sm:$0xff]  ;;  %v359_v42 = vld [vmem:[#allocation11 + $0x10] sm:$0xff]  ;;  %s351_s2 = sadd.s32 %s981_s30, %s1632_s18  ;;  %s1677_s8 = sld [smem:[#allocation7 + %s311_s24]] }
  0x9c   : >> { %1041 = vmatprep.subr.bf16.mxu1 %v1040_v6  ;;  %v364_v36 = vld [vmem:[#allocation11 + $0x38] sm:$0xff]  ;;  %v361_v41 = vld [vmem:[#allocation11 + $0x20] sm:$0xff]  ;;  %v363_v44 = vld [vmem:[#allocation11 + $0x30] sm:$0xff]  ;;  %s1679_s10 = sld [smem:[#allocation7 + %s319_s27]]  ;;  %s297_s15 = scalar_lea.vmem [#allocation8], %s1637_s28 }
  0x9d   : >> { %v1084_v43 = vpack.c.bf16 %v364_v36, %v360_v35  ;;  %v366_v45 = vld [vmem:[#allocation11 + $0x48] sm:$0xff]  ;;  %v368_v47 = vld [vmem:[#allocation11 + $0x58] sm:$0xff]  ;;  %v1054_v50 = vpack.c.bf16 %v361_v41, %v357_v40  ;;  %v1086_v51 = vpack.c.bf16 %v363_v44, %v359_v42  ;;  %v365_v53 = vld [vmem:[#allocation11 + $0x40] sm:$0xff]  ;;  %s1681_s1 = sld [smem:[#allocation7 + %s327_s25]]  ;;  %s305_s17 = scalar_lea.vmem [#allocation8], %s1640_s26 }
  0x9e   : >> { %1011 = vmatpush1.bf16.msra.mxu0 %v1010_v13  ;;  %v370_v46 = vld [vmem:[#allocation11 + $0x68] sm:$0xff]  ;;  %v372_v48 = vld [vmem:[#allocation11 + $0x78] sm:$0xff]  ;;  %v369_v54 = vld [vmem:[#allocation11 + $0x60] sm:$0xff]  ;;  %s1683_s3 = sld [smem:[#allocation7 + %s335_s19]] }
  0x9f   : >> { %1043 = vmatpush1.bf16.msra.mxu1 %v1042_v14  ;;  %1013 = vmatprep.subr.bf16.mxu0 %v1012_v15  ;;  %v421_v49 = vld [vmem:[#allocation3] sm:$0xff]  ;;  %v1056_v52 = vpack.c.bf16 %v370_v46, %v366_v45  ;;  %v367_v55 = vld [vmem:[#allocation11 + $0x50] sm:$0xff]  ;;  %v1088_v56 = vpack.c.bf16 %v372_v48, %v368_v47  ;;  %s1685_s18 = sld [smem:[#allocation7 + %s343_s23]]  ;;  %v376_v60 = vld [vmem:[#allocation11 + $0x98] sm:$0xff]  ;;  %v1058_v62 = vpack.c.bf16 %v369_v54, %v365_v53 }
  0xa0   : >> { %1045 = vmatprep.subr.bf16.mxu1 %v1044_v19  ;;  %v371_v57 = vld [vmem:[#allocation11 + $0x70] sm:$0xff]  ;;  %v374_v58 = vld [vmem:[#allocation11 + $0x88] sm:$0xff]  ;;  %s1687_s9 = sld [smem:[#allocation7 + %s351_s2]]  ;;  %v380_v61 = vld [vmem:[#allocation11 + $0xb8] sm:$0xff] }
  0xa1   : >> { %v378_v59 = vld [vmem:[#allocation11 + $0xa8] sm:$0xff]  ;;  %v1090_v63 = vpack.c.bf16 %v371_v57, %v367_v55  ;;  %v373_v1 = vld [vmem:[#allocation11 + $0x80] sm:$0xff]  ;;  %v375_v3 = vld [vmem:[#allocation11 + $0x90] sm:$0xff]  ;;  %v1092_v4 = vpack.c.bf16 %v380_v61, %v376_v60  ;;  %s313_s30 = scalar_lea.vmem [#allocation8], %s1677_s8 }
  0xa2   : >> { %1015 = vmatpush1.bf16.msra.mxu0 %v1014_v25  ;;  %v1060_v0 = vpack.c.bf16 %v378_v59, %v374_v58  ;;  %v377_v2 = vld [vmem:[#allocation11 + $0xa0] sm:$0xff]  ;;  %v379_v5 = vld [vmem:[#allocation11 + $0xb0] sm:$0xff]  ;;  %v382_v6 = vld [vmem:[#allocation11 + $0xc8] sm:$0xff]  ;;  %s321_s24 = scalar_lea.vmem [#allocation8], %s1679_s10 }
  0xa3   : >> { %1047 = vmatpush1.bf16.msra.mxu1 %v1046_v26  ;;  %1017 = vmatprep.subr.bf16.mxu0 %v1016_v27  ;;  %v386_v7 = vld [vmem:[#allocation11 + $0xe8] sm:$0xff]  ;;  %v384_v9 = vld [vmem:[#allocation11 + $0xd8] sm:$0xff]  ;;  %v1062_v11 = vpack.c.bf16 %v377_v2, %v373_v1  ;;  %v381_v12 = vld [vmem:[#allocation11 + $0xc0] sm:$0xff]  ;;  %v1094_v14 = vpack.c.bf16 %v379_v5, %v375_v3  ;;  %s329_s27 = scalar_lea.vmem [#allocation8], %s1681_s1  ;;  %s985_s1 = sshll.u32 (%p285_p1), %s1483_s0, 7 }
  0xa4   : >> { %1049 = vmatprep.subr.bf16.mxu1 %v1048_v31  ;;  %v388_v10 = vld [vmem:[#allocation11 + $0xf8] sm:$0xff]  ;;  %v385_v13 = vld [vmem:[#allocation11 + $0xe0] sm:$0xff]  ;;  %v1064_v15 = vpack.c.bf16 %v386_v7, %v382_v6  ;;  %v383_v16 = vld [vmem:[#allocation11 + $0xd0] sm:$0xff]  ;;  %s337_s25 = scalar_lea.vmem [#allocation8], %s1683_s3  ;;  %s1799_s3 = scalar_lea.vmem (%p285_p1), [#allocation14], %s1612_s22 }
  0xa5   : >> { %v387_v17 = vld [vmem:[#allocation11 + $0xf0] sm:$0xff]  ;;  %v390_v18 = vld [vmem:[#allocation11 + $0x108] sm:$0xff]  ;;  %v1096_v19 = vpack.c.bf16 %v388_v10, %v384_v9  ;;  %v392_v21 = vld [vmem:[#allocation11 + $0x118] sm:$0xff]  ;;  %v1066_v27 = vpack.c.bf16 %v385_v13, %v381_v12  ;;  %s345_s28 = scalar_lea.vmem [#allocation8], %s1685_s18  ;;  %s872_s18 = sshll.u32 (%p285_p1), %s1799_s3, 4  ;;  %s1719_s18 = int_to_ptr.vmem [resolvable:$true] %s872_s18 }
  0xa6   : >> { %1019 = vmatpush1.bf16.msra.mxu0 %v1018_v37  ;;  %v394_v20 = vld [vmem:[#allocation11 + $0x128] sm:$0xff]  ;;  %v389_v22 = vld [vmem:[#allocation11 + $0x100] sm:$0xff]  ;;  %v1098_v31 = vpack.c.bf16 %v387_v17, %v383_v16  ;;  %v391_v33 = vld [vmem:[#allocation11 + $0x110] sm:$0xff]  ;;  %s353_s26 = scalar_lea.vmem [#allocation8], %s1687_s9  ;;  %s1409_s0 = smov (%p285_p1), [#allocation14]  }
  0xa7   : >> { %1051 = vmatpush1.bf16.msra.mxu1 %v1050_v38  ;;  %1053 = vmatprep.subr.bf16.mxu0 %v1052_v39  ;;  %v393_v23 = vld [vmem:[#allocation11 + $0x120] sm:$0xff]  ;;  %v1068_v32 = vpack.c.bf16 %v394_v20, %v390_v18  ;;  %v395_v37 = vld [vmem:[#allocation11 + $0x130] sm:$0xff]  ;;  %v398_v38 = vld [vmem:[#allocation11 + $0x148] sm:$0xff] }
  0xa8   : >> { %1085 = vmatprep.subr.bf16.mxu1 %v1084_v43  ;;  %v298_v24 = vld [vmem:[%s297_s15] sm:$0x1]  ;;  %v402_v39 = vld [vmem:[#allocation11 + $0x168] sm:$0xff]  ;;  %v400_v40 = vld [vmem:[#allocation11 + $0x158] sm:$0xff]  ;;  %v1070_v42 = vpack.c.bf16 %v393_v23, %v389_v22  ;;  %v1102_v43 = vpack.c.bf16 %v395_v37, %v391_v33 }
  0xa9   : >> { %551 = vmatmul.mubr.f32.vlgmr.msra.gmra.mrb[0].mxu0 %v421_v49  ;;  %v306_v25 = vld [vmem:[%s305_s17] sm:$0x1]  ;;  %299 = vst [vmem:[#allocation2] sm:$0x1] %v298_v24  ;;  %v404_v41 = vld [vmem:[#allocation11 + $0x178] sm:$0xff]  ;;  %v1072_v44 = vpack.c.bf16 %v402_v39, %v398_v38  ;;  %v399_v47 = vld [vmem:[#allocation11 + $0x150] sm:$0xff]  ;;  %s1717_s17 = scalar_lea.hbm (%p285_p1), %s1770_s7, %s985_s1 }
  0xaa   : >> { %622 = vmatmul.mubr.f32.vlgmr.msra.gmra.mrb[0].mxu1 %v421_v49  ;;  %1055 = vmatpush1.bf16.msra.mxu0 %v1054_v50  ;;  %v314_v26 = vld [vmem:[%s313_s30] sm:$0x1]  ;;  %307 = vst [vmem:[#allocation2 + $0x1] sm:$0x1] %v306_v25  ;;  %v1104_v48 = vpack.c.bf16 %v404_v41, %v400_v40  ;;  %v403_v49 = vld [vmem:[#allocation11 + $0x170] sm:$0xff]  ;;  %v406_v50 = vld [vmem:[#allocation11 + $0x188] sm:$0xff]  ;;  %s1800_s30 = smov (%p285_p1), %s1799_s3 }
  0xab   : >> { %1087 = vmatpush1.bf16.msra.mxu1 %v1086_v51  ;;  %1057 = vmatprep.subr.bf16.mxu0 %v1056_v52  ;;  %315 = vst [vmem:[#allocation2 + $0x2] sm:$0x1] %v314_v26  ;;  %v322_v28 = vld [vmem:[%s321_s24] sm:$0x1]  ;;  %v410_v51 = vld [vmem:[#allocation11 + $0x1a8] sm:$0xff]  ;;  %v408_v52 = vld [vmem:[#allocation11 + $0x198] sm:$0xff]  ;;  %v1106_v55 = vpack.c.bf16 %v403_v49, %v399_v47 }
  0xac   : >> { %1089 = vmatprep.subr.bf16.mxu1 %v1088_v56  ;;  %692 = vmatprep.mubr.f32.mxu0 %v1408_v8  ;;  %v330_v29 = vld [vmem:[%s329_s27] sm:$0x1]  ;;  %323 = vst [vmem:[#allocation2 + $0x3] sm:$0x1] %v322_v28  ;;  %v412_v53 = vld [vmem:[#allocation11 + $0x1b8] sm:$0xff]  ;;  %v1076_v56 = vpack.c.bf16 %v410_v51, %v406_v50  ;;  %v407_v59 = vld [vmem:[#allocation11 + $0x190] sm:$0xff] }
  0xad   : >> { %763 = vmatprep.mubr.f32.mxu1 %v1408_v8  ;;  %v396_v8 = vld [vmem:[#allocation11 + $0x138] sm:$0xff]  ;;  %v338_v30 = vld [vmem:[%s337_s25] sm:$0x1]  ;;  %331 = vst [vmem:[#allocation2 + $0x4] sm:$0x1] %v330_v29  ;;  %v1108_v60 = vpack.c.bf16 %v412_v53, %v408_v52  ;;  %v411_v61 = vld [vmem:[#allocation11 + $0x1b0] sm:$0xff] }
  0xae   : >> { %1059 = vmatpush1.bf16.msra.mxu0 %v1058_v62  ;;  %339 = vst [vmem:[#allocation2 + $0x5] sm:$0x1] %v338_v30  ;;  %v346_v34 = vld [vmem:[%s345_s28] sm:$0x1]  ;;  %v1100_v36 = vpack.c.bf16 %v396_v8, %v392_v21  ;;  %v414_v62 = vld [vmem:[#allocation11 + $0x1c8] sm:$0xff]  ;;  %v420_v1 = vld [vmem:[#allocation11 + $0x1f8] sm:$0xff]  ;;  %v1110_v3 = vpack.c.bf16 %v411_v61, %v407_v59 }
  0xaf   : >> { %1091 = vmatpush1.bf16.msra.mxu1 %v1090_v63  ;;  %1061 = vmatprep.subr.bf16.mxu0 %v1060_v0  ;;  %v354_v35 = vld [vmem:[%s353_s26] sm:$0x1]  ;;  %347 = vst [vmem:[#allocation2 + $0x6] sm:$0x1] %v346_v34  ;;  %v418_v63 = vld [vmem:[#allocation11 + $0x1e8] sm:$0xff]  ;;  %v416_v0 = vld [vmem:[#allocation11 + $0x1d8] sm:$0xff] }
  0xb0   : >> { %1093 = vmatprep.subr.bf16.mxu1 %v1092_v4  ;;  %355 = vst [vmem:[#allocation2 + $0x7] sm:$0x1] %v354_v35  ;;  %v397_v45 = vld [vmem:[#allocation11 + $0x140] sm:$0xff]  ;;  %v1080_v4 = vpack.c.bf16 %v418_v63, %v414_v62  ;;  %v1112_v7 = vpack.c.bf16 %v420_v1, %v416_v0  ;;  %v415_v9 = vld [vmem:[#allocation11 + $0x1d0] sm:$0xff]  ;;  %v823_v53 = vld [vmem:[#allocation5] sm:$0xff]  ;;  %s1801_s24 = sand.u32 (%p285_p1), 1, %s1385_s12  }
  0xb1   : >> { %v401_v46 = vld [vmem:[#allocation11 + $0x160] sm:$0xff]  ;;  %v419_v10 = vld [vmem:[#allocation11 + $0x1f0] sm:$0xff]  ;;  %s859_s27 = scalar_lea.sflag (%p285_p1), [#allocation10], %s1801_s24  ;;  %s1317_s25 = scalar_lea.vmem (%p285_p1), %s1719_s18, 128 }
  0xb2   : >> { %1063 = vmatpush1.bf16.msra.mxu0 %v1062_v11  ;;  %v1074_v54 = vpack.c.bf16 %v401_v46, %v397_v45  ;;  %v405_v57 = vld [vmem:[#allocation11 + $0x180] sm:$0xff]  ;;  %v1114_v12 = vpack.c.bf16 %v419_v10, %v415_v9  ;;  %p1318_p2 = scmp.ne.s32.totalorder (%p285_p1), %s1719_s18, %s1317_s25  ;;  %s1321_s28 = sshll.u32 (%p285_p1), %s1409_s0, 4  ;;  %s1322_s28 = int_to_ptr.vmem [resolvable:$false] %s1321_s28 }
  0xb3   : >> { %1095 = vmatpush1.bf16.msra.mxu1 %v1094_v14  ;;  %1065 = vmatprep.subr.bf16.mxu0 %v1064_v15  ;;  %v409_v58 = vld [vmem:[#allocation11 + $0x1a0] sm:$0xff]  ;;  %v772_v14 = vlaneseq  ;;  %s1323_s26 = scalar_lea.vmem (%p285_p1), %s1322_s28, 256  ;;  %p1324_p7 = scmp.lt.s32.totalorder (%p285_p1), %s1719_s18, %s1322_s28 }
  0xb4   : >> { %1097 = vmatprep.subr.bf16.mxu1 %v1096_v19  ;;  %v1078_v2 = vpack.c.bf16 %v409_v58, %v405_v57  ;;  %v413_v5 = vld [vmem:[#allocation11 + $0x1c0] sm:$0xff]  ;;  %p1319_p5 = pnand (%p285_p1), %p1318_p2, %p1802_p4  ;;  %p1325_p10 = scmp.lt.s32.totalorder (%p285_p1), %s1323_s26, %s1317_s25 }
  0xb5   : >> { %v417_v6 = vld [vmem:[#allocation11 + $0x1e0] sm:$0xff]  ;;  %v773_v15 = vshrl.u32 %v772_v14, 7 }
  0xb6   : >> { %1067 = vmatpush1.bf16.msra.mxu0 %v1066_v27  ;;  %v1082_v11 = vpack.c.bf16 %v417_v6, %v413_v5  ;;  %v770_v17 = vld [vmem:[%s1767_s4] sm:$0xf]  ;;  %p1320_p6 = pneg (%p285_p1), %p1319_p5  ;;  %p1326_p11 = por (%p285_p1), %p1325_p10, %p1324_p7 }
  0xb7   : >> { %1099 = vmatpush1.bf16.msra.mxu1 %v1098_v31  ;;  %1069 = vmatprep.subr.bf16.mxu0 %v1068_v32  ;;  %v356_v13 = vld [vmem:[#allocation2] sm:$0xff]  ;;  %v774_v16 = vsub.s32 0, %v773_v15  ;;  %v778_v18 = vsub.s32 1, %v773_v15  ;;  %v786_v21 = vsub.s32 3, %v773_v15  ;;  %v782_v33 = vsub.s32 2, %v773_v15 }
  0xb8   : >> { %1101 = vmatprep.subr.bf16.mxu1 %v1100_v36  ;;  %v983_v6 = vld [vmem:[%s1769_s6] ss:$0 sm:$0xff] (%p285_p1)  ;;  %p1327_p0 = pnand (%p285_p1), %p1326_p11, %p1320_p6 }
  0xb9   : >> { %v775_v19 = vrot.slane %v770_v17, %v774_v16  ;;  %v779_v20 = vrot.slane %v770_v17, %v778_v18  ;;  %v787_v27 = vrot.slane %v770_v17, %v786_v21  ;;  %v783_v35 = vrot.slane %v770_v17, %v782_v33 }
  0xba   : >> { %1071 = vmatpush1.bf16.msra.mxu0 %v1070_v42 }
  0xbb   : >> { %1103 = vmatpush1.bf16.msra.mxu1 %v1102_v43  ;;  %1073 = vmatprep.subr.bf16.mxu0 %v1072_v44  ;;  %v815_v44 = vld [vmem:[#allocation4] sm:$0xff] }
  0xbc   : >> { %1105 = vmatprep.subr.bf16.mxu1 %v1104_v48 }
  0xbe   : >> { %1075 = vmatpush1.bf16.msra.mxu0 %v1074_v54 }
  0xbf   : >> { %1107 = vmatpush1.bf16.msra.mxu1 %v1106_v55  ;;  %1077 = vmatprep.subr.bf16.mxu0 %v1076_v56 }
  0xc0   : >> { %1109 = vmatprep.subr.bf16.mxu1 %v1108_v60 }
  0xc2   : >> { %1079 = vmatpush1.bf16.msra.mxu0 %v1078_v2 }
  0xc3   : >> { %1111 = vmatpush1.bf16.msra.mxu1 %v1110_v3  ;;  %1081 = vmatprep.subr.bf16.mxu0 %v1080_v4  ;;  %v982_v4 = vld [vmem:[%s1768_s5] ss:$0 sm:$0xff] (%p285_p1) }
  0xc4   : >> { %1113 = vmatprep.subr.bf16.mxu1 %v1112_v7 }
  0xc6   : >> { %1083 = vmatpush1.bf16.msra.mxu0 %v1082_v11 }
  0xc7   : >> { %1115 = vmatpush1.bf16.msra.mxu1 %v1114_v12 }
  0xc9   : >> { %693 = vmatmul.mubr.f32.vlgmr.msra.gmra.mrb[0].mxu0 %v356_v13 }
  0xca   : >> { %764 = vmatmul.mubr.f32.vlgmr.msra.gmra.mrb[0].mxu1 %v356_v13 }
 0x19c   : >> { %v694_v8 = vpop.f32.mrb[0].mxu0 }
 0x19d   : >> { %v792_v22 = vadd.f32 %v775_v19, %v694_v8  ;;  %v765_v23 = vpop.f32.mrb[0].mxu1  ;;  %v696_v24 = vpop.f32.mrb[1].mxu0 }
 0x19e   : >> { %v793_v25 = vadd.f32 %v779_v20, %v696_v24  ;;  %v767_v26 = vpop.f32.mrb[1].mxu1  ;;  %v794_v37 = vadd.f32 %v783_v35, %v765_v23 }
 0x19f   : >> { %v796_v28 = vsub.f32 0.0, %v792_v22  ;;  %v795_v32 = vadd.f32 %v787_v27, %v767_v26 }
 0x1a0   : >> { %v802_v29 = vsub.f32 0.0, %v793_v25 }
 0x1a1   : >> { %v797_v30 = vmul.f32 1.442695, %v796_v28  ;;  %v809_v34 = vsub.f32 0.0, %v795_v32 }
 0x1a2   : >> { %v803_v31 = vmul.f32 1.442695, %v802_v29 }
 0x1a3   : >> { %1205 = vpow2.f32 %v797_v30  ;;  %v810_v36 = vmul.f32 1.442695, %v809_v34 }
 0x1a4   : >> { %1207 = vpow2.f32 %v803_v31 }
 0x1a5   : >> { %1209 = vpow2.f32 %v810_v36 }
 0x1a6   : >> { %1211 = vtanh.f32 %v794_v37 }
 0x1ad   : >> { %v1206_v38 = vpop.eup %1205 }
 0x1ae   : >> { %v1208_v39 = vpop.eup %1207  ;;  %v799_v40 = vadd.f32 1.0, %v1206_v38 }
 0x1af   : >> { %v805_v41 = vadd.f32 1.0, %v1208_v39  ;;  %v1210_v42 = vpop.eup %1209 }
 0x1b0   : >> { %1213 = vrcp.f32 %v799_v40  ;;  %v1212_v43 = vpop.eup %1211  ;;  %v812_v48 = vadd.f32 1.0, %v1210_v42 }
 0x1b1   : >> { %1215 = vrcp.f32 %v805_v41 }
 0x1b2   : >> { %1217 = vrcp.f32 %v812_v48 }
 0x1ba   : >> { %v1214_v45 = vpop.eup %1213 }
 0x1bb   : >> { %v1216_v46 = vpop.eup %1215  ;;  %v817_v47 = vmul.f32 %v1214_v45, %v1212_v43 }
 0x1bc   : >> { %v816_v49 = vmul.f32 %v1216_v46, %v815_v44  ;;  %v1218_v51 = vpop.eup %1217 }
 0x1be   : >> { %v818_v50 = vadd.f32 %v817_v47, %v816_v49 }
 0x1c0   : >> { %1219 = vtanh.f32 %v818_v50  ;;  %821 = vst [vmem:[#allocation4] sm:$0xff] %v818_v50 }
 0x1c9   : > { %287 = sbr.rel (!%p285_p1) target bundleno = 133 (0x85), region = 104 }
 0x1ca   : >> { %v1220_v52 = vpop.eup %1219 }
 0x1cb   : >> { %v820_v54 = vmul.f32 %v1220_v52, %v1218_v51 }
 0x1cd   : >> { %822 = vst [vmem:[#allocation3] sm:$0xff] %v820_v54  ;;  %v824_v55 = vadd.f32 %v823_v53, %v820_v54 }
 0x1cf   : >> { %825 = vst [vmem:[#allocation5] sm:$0xff] %v824_v55 }
 0x1d6   : > { %v826_v56 = vld [vmem:[#allocation5] sm:$0xff] }
 0x1d7   : > { %v827_v57 = vmul.f32 0.0625, %v826_v56 }
 0x1d9   : > { %828 = vadd.xlane.f32.xlu0 %v827_v57  ;;  %v831_v58 = vmul.f32 %v827_v57, %v827_v57 }
 0x1dd   : > { %832 = vadd.xlane.f32.xlu0 %v831_v58 }
 0x266   : > { %v829_v59 = vpop.xlane.xlu0 %828 }
 0x267   : > { %v830_v60 = vmul.f32 0.0078125, %v829_v59 }
 0x269   : > { %v835_v62 = vmul.f32 %v830_v60, %v830_v60  ;;  %v837_v2 = vsub.f32 %v827_v57, %v830_v60 }
 0x26a   : > { %v833_v61 = vpop.xlane.xlu0 %832 }
 0x26b   : > { %v834_v63 = vmul.f32 0.0078125, %v833_v61 }
 0x26d   : > { %v836_v0 = vsub.f32 %v834_v63, %v835_v62 }
 0x26f   : > { %v838_v1 = vadd.f32 1e-05, %v836_v0 }
 0x271   : > { %1221 = vrsqrt.f32 %v838_v1 }
 0x27b   : > { %v1222_v3 = vpop.eup %1221 }
 0x27c   : > { %v840_v5 = vmul.f32 %v1222_v3, %v837_v2 }
 0x27e   : > { %v848_v7 = vmul.f32 %v982_v4, %v840_v5 }
 0x280   : > { %v856_v9 = vadd.f32 %v983_v6, %v848_v7 }
 0x282   : > { %857 = vst [vmem:[%s1800_s30] sm:$0xff] %v856_v9 }
 0x283   : > { %1330 = shalt.err (!%p1327_p0)
}
 0x284   : > { %s1331_s22 = scalar_lea.hbm %s1717_s17, 128  ;;  %s1335_s29 = scalar_lea.hbm %s1770_s7, 256 }
 0x285   : > { %p1332_p8 = scmp.ne.s32.totalorder %s1717_s17, %s1331_s22  ;;  %p1336_p12 = scmp.lt.u32.totalorder %s1717_s17, %s1770_s7 }
 0x286   : > { %p1337_p13 = scmp.lt.u32.totalorder %s1335_s29, %s1331_s22  ;;  %p1339_p2 = scmp.lt.u32.totalorder %s1331_s22, %s1717_s17 }
 0x287   : > { %p1333_p3 = pnand %p1332_p8, %p1802_p4 }
 0x288   : > { %p1338_p1 = por %p1337_p13, %p1336_p12 }
 0x289   : > { %p1334_p9 = pneg %p1333_p3 }
 0x28a   : > { %p1340_p5 = por %p1339_p2, %p1338_p1 }
 0x28c   : > { %p1341_p6 = pnand %p1340_p5, %p1334_p9 }
 0x28e   : > { %1344 = shalt.err (!%p1341_p6)
}
 0x28f   : > { %1132 = dma.vmem_to_hbm [thread:$0]  (%p1802_p4), %s1719_s18, 128, %s1717_s17, %s859_s27  }
 0x290 PF: > { %p1154_p7 = scmp.ge.s32.totalorder %s1393_s14, 2  ;;  %s884_s8 = sand.u32 1, %s1381_s11  }
 0x291   : > { %p1803_p10 = scmp.ne.s32.totalorder %s1783_s21, 0  ;;  %s885_s1 = scalar_lea.sflag [#allocation10], %s884_s8 }
 0x293   : > { %p1145_p11 = pnand %p1154_p7, %p1803_p10 }
 0x295   : > { %1376 = dma.done.wait (!%p1145_p11), %s885_s1, 128  }
 0x296   : > { %1378 = vsyncadd (!%p1145_p11), %s885_s1, 4294967168  ;;  %s1804_s3 = sld [smem:[#allocation19_spill]]  ;;  %p23_p0 = scmp.ge.s32.totalorder %s1487_s16, 4  }
 0x297   : > { %s1805_s11 = smov %s1385_s12  ;;  %s1806_s12 = smov %s1389_s13 }
 0x298   : > { %s1808_s14 = smov %s1487_s16  ;;  %25 = sbr.rel (!%p23_p0) target bundleno = 18 (0x12), region = 115 }
 0x29c   : > { %s1807_s13 = smov %s1804_s3 }
 0x29f   :  { %890 = vsyncpa [#allocation9], 1 }
 0x2a0   :  { %892 = vsyncpa [#allocation9 + $0x1], 1 }
 0x2a1   :  { %893 = vsyncpa [#allocation12], 1 }
 0x2a2   :  { %894 = vsyncpa [#allocation10], 1 }
 0x2a3   :  { %896 = vsyncpa [#allocation10 + $0x1], 1 }

</bundles_post_ra>
